<compile_context>
chip_gen: v7x
topology: tpu7x:2x2x1
jax: 0.10.0
libtpu: 0.0.40
codegen_flags: <defaults>
</compile_context>

<pallas_src>
import functools

import jax
import jax.numpy as jnp
from jax import lax
from jax.experimental import pallas as pl
from jax.experimental.pallas import tpu as pltpu


VMEM_LIMIT_BYTES = 32 * 1024 * 1024   # explicit scoped-VMEM budget (v5e/v6e/v7x safe)
VMEM_BLOCK_BUDGET = 24 * 1024 * 1024  # target working set for block sizing


def _round_up(v, m):
    return ((v + m - 1) // m) * m


# ----------------------------------------------------------------------------
# Kernel 1: fused batched projection
#   xproj[b] = theta[b] @ x[b]^T,  yproj[b] = theta[b] @ y[b]^T   -> [B, L, N]
# ----------------------------------------------------------------------------
def _dual_proj_kernel(x_ref, y_ref, th_ref, xout_ref, yout_ref):
    # x_ref/y_ref: (Bt, N_pad, D), th_ref: (Bt, L, D), outs: (Bt, L, N_pad)
    bt = x_ref.shape[0]
    dn = (((1,), (1,)), ((), ()))  # contract over D, no explicit transpose
    for b in range(bt):  # Bt is small & static -> fully unrolled
        th = th_ref[b]                                   # (L, D)
        xout_ref[b] = lax.dot_general(th, x_ref[b], dn,
                                      preferred_element_type=jnp.float32)
        yout_ref[b] = lax.dot_general(th, y_ref[b], dn,
                                      preferred_element_type=jnp.float32)


def project_pair(x, y, theta):
    """x, y: [B, N, D] f32, theta: [B, L, D] f32 -> (xproj, yproj) [B, L, N]."""
    B, N, D = x.shape
    L = theta.shape[1]
    N_pad = _round_up(N, 128)  # lane-dense output stores

    # Batch-block size: amortize per-step overhead, stay inside the VMEM
    # budget (2 in-blocks + theta + 2 out-blocks, double buffered).
    per_batch_bytes = 4 * (2 * N_pad * D + L * D + 2 * L * N_pad)
    bt = max(1, min(8, B, VMEM_BLOCK_BUDGET // (2 * per_batch_bytes)))
    if B >= 2:
        # Keep at least 2 grid steps so the batch axis can shard across
        # v7x's two TensorCores.
        bt = min(bt, max(1, B // 2))
    B_pad = _round_up(B, bt)

    if N_pad != N:
        padN = [(0, 0), (0, N_pad - N), (0, 0)]
        x = jnp.pad(x, padN)
        y = jnp.pad(y, padN)
    if B_pad != B:
        padB = [(0, B_pad - B), (0, 0), (0, 0)]
        x = jnp.pad(x, padB)
        y = jnp.pad(y, padB)
        theta = jnp.pad(theta, padB)

    xproj_p, yproj_p = pl.pallas_call(
        _dual_proj_kernel,
        out_shape=(jax.ShapeDtypeStruct((B_pad, L, N_pad), jnp.float32),
                   jax.ShapeDtypeStruct((B_pad, L, N_pad), jnp.float32)),
        grid_spec=pltpu.PrefetchScalarGridSpec(
            num_scalar_prefetch=0,
            grid=(B_pad // bt,),
            in_specs=[
                pl.BlockSpec((bt, N_pad, D), lambda i: (i, 0, 0)),
                pl.BlockSpec((bt, N_pad, D), lambda i: (i, 0, 0)),
                pl.BlockSpec((bt, L, D), lambda i: (i, 0, 0)),
            ],
            out_specs=[
                pl.BlockSpec((bt, L, N_pad), lambda i: (i, 0, 0)),
                pl.BlockSpec((bt, L, N_pad), lambda i: (i, 0, 0)),
            ],
        ),
        compiler_params=pltpu.CompilerParams(
            dimension_semantics=("parallel",),
            vmem_limit_bytes=VMEM_LIMIT_BYTES,
        ),
    )(x, y, theta)

    return xproj_p[:B, :, :N], yproj_p[:B, :, :N]


# ----------------------------------------------------------------------------
# Kernel 2: tiled mean of squared differences over all elements
#   - inputs flattened to a (rows, 128*k) slab (lane-dense, unmasked loads)
#   - grid over row chunks, each step writes a lane-dense partial-sum block
#     ("parallel" axis -> shards across v7x's 2 TCs); final combine in JAX.
# ----------------------------------------------------------------------------
def _sqdiff_partial_kernel(sx_ref, sy_ref, out_ref):
    d = sx_ref[...] - sy_ref[...]
    s = jnp.sum(d * d)
    out_ref[...] = jnp.broadcast_to(s, out_ref.shape)


def sqdiff_mean(sx, sy):
    """sx, sy: same-shape f32 arrays -> scalar f32 mean((sx - sy)**2)."""
    total = sx.size  # static python int under jit
    fx = sx.reshape(-1)
    fy = sy.reshape(-1)

    # Lane width: multiple of 128, grown while there is enough data.
    cols = 128
    while cols < 2048 and total >= cols * 2 * 8:
        cols *= 2
    rows = _round_up(total, cols) // cols
    block_rows = min(256, _round_up(rows, 8))
    rows_pad = _round_up(rows, block_rows)
    padded = rows_pad * cols
    if padded != total:
        fx = jnp.pad(fx, (0, padded - total))  # zero pad -> contributes 0
        fy = jnp.pad(fy, (0, padded - total))
    fx = fx.reshape(rows_pad, cols)
    fy = fy.reshape(rows_pad, cols)
    grid_n = rows_pad // block_rows

    partials = pl.pallas_call(
        _sqdiff_partial_kernel,
        out_shape=jax.ShapeDtypeStruct((grid_n, 8, 128), jnp.float32),
        grid_spec=pltpu.PrefetchScalarGridSpec(
            num_scalar_prefetch=0,
            grid=(grid_n,),
            in_specs=[
                pl.BlockSpec((block_rows, cols), lambda i: (i, 0)),
                pl.BlockSpec((block_rows, cols), lambda i: (i, 0)),
            ],
            out_specs=pl.BlockSpec((1, 8, 128), lambda i: (i, 0, 0)),
        ),
        compiler_params=pltpu.CompilerParams(
            dimension_semantics=("parallel",),
            vmem_limit_bytes=VMEM_LIMIT_BYTES,
        ),
    )(fx, fy)

    return jnp.sum(partials[:, 0, 0]) * (1.0 / float(total))


# ----------------------------------------------------------------------------
# PW forward (mirrors the PyTorch module semantics, orthogonal=False path)
# ----------------------------------------------------------------------------
def minibatch_rand_projections(key, batchsize, dim, num_projections):
    p = jax.random.normal(key, (batchsize, num_projections, dim),
                          dtype=jnp.float32)
    return p / jnp.sqrt(jnp.sum(p * p, axis=2, keepdims=True))


@functools.partial(jax.jit, static_argnames=("num_projs",))
def pw_forward(x, y, key, num_projs):
    """
    x, y: [B, N, D] float32 point clouds.
    Returns {'loss': scalar} matching PW.forward (orthogonal=False path).
    """
    B, N, D = x.shape
    # TODO(synk): orthogonal=True path (torch.nn.init.orthogonal_) not
    # implemented; only the default random-projection path is reproduced here.
    projections = minibatch_rand_projections(key, B, D, num_projs)  # [B, L, D]

    xproj, yproj = project_pair(x, y, projections)  # each [B, L, N]

    # TODO(synk): argsort has no clean Pallas TPU primitive; done in plain JAX.
    xidx = jnp.argsort(xproj, axis=2)  # [B, L, N]
    yidx = jnp.argsort(yproj, axis=2)  # [B, L, N]

    # TODO(synk): the gather + squared-diff could be fused into one Pallas
    # kernel (x[b] resident in VMEM, one-hot-matmul gather on the MXU) to
    # avoid materializing the [B, L, N, D] sorted tensors in HBM; kept in
    # plain JAX for portability/robustness of the gather lowering.
    gather = jax.vmap(lambda pts, idx: pts[idx])
    sorted_x = gather(x, xidx)  # [B, L, N, D]
    sorted_y = gather(y, yidx)

    loss = sqdiff_mean(sorted_x, sorted_y)
    return {"loss": loss}


if __name__ == "__main__":
    key = jax.random.PRNGKey(0)
    kx, ky, kp = jax.random.split(key, 3)

    B, N, D = 2, 16, 4      # batch, points per cloud, point dim
    num_projs = 8           # L

    x = jax.random.normal(kx, (B, N, D), dtype=jnp.float32)
    y = jax.random.normal(ky, (B, N, D), dtype=jnp.float32)

    out = pw_forward(x, y, kp, num_projs=num_projs)
    loss = jax.block_until_ready(out["loss"])

    # quick sanity check against a pure-JAX reference of the same math
    proj_ref = minibatch_rand_projections(kp, B, D, num_projs)
    xp_ref = jnp.einsum("bnd,bld->bln", x, proj_ref)
    yp_ref = jnp.einsum("bnd,bld->bln", y, proj_ref)
    sx_ref = jax.vmap(lambda p, i: p[i])(x, jnp.argsort(xp_ref, axis=2))
    sy_ref = jax.vmap(lambda p, i: p[i])(y, jnp.argsort(yp_ref, axis=2))
    ref = jnp.mean((sx_ref - sy_ref) ** 2)
    assert jnp.allclose(loss, ref, rtol=1e-5, atol=1e-5), (loss, ref)

    print("KERNEL_OK")
</pallas_src>

<mosaic_0001>
module attributes {stable_mosaic.version = 11 : i64} {
  func.func @_dual_proj_kernel(%arg0: i32, %arg1: memref<1x128x4xf32, #tpu.memory_space<vmem>>, %arg2: memref<1x128x4xf32, #tpu.memory_space<vmem>>, %arg3: memref<1x8x4xf32, #tpu.memory_space<vmem>>, %arg4: memref<1x8x128xf32, #tpu.memory_space<vmem>>, %arg5: memref<1x8x128xf32, #tpu.memory_space<vmem>>) attributes {dimension_semantics = [#tpu.dimension_semantics<parallel>], iteration_bounds = array<i64: 2>, scalar_prefetch = 0 : i64, scratch_operands = 0 : i64, tpu.core_type = #tpu.core_type<tc>, window_params = [{transform_indices = @transform_0, window_bounds = array<i64: 1, 128, 4>}, {transform_indices = @transform_1, window_bounds = array<i64: 1, 128, 4>}, {transform_indices = @transform_2, window_bounds = array<i64: 1, 8, 4>}, {transform_indices = @transform_3, window_bounds = array<i64: 1, 8, 128>}, {transform_indices = @transform_4, window_bounds = array<i64: 1, 8, 128>}]} {
    %c0 = arith.constant 0 : index
    %c0_0 = arith.constant 0 : index
    %c0_1 = arith.constant 0 : index
    %0 = vector.load %arg3[%c0, %c0_0, %c0_1] : memref<1x8x4xf32, #tpu.memory_space<vmem>>, vector<1x8x4xf32>
    %1 = vector.shape_cast %0 : vector<1x8x4xf32> to vector<8x4xf32>
    %c0_2 = arith.constant 0 : index
    %c0_3 = arith.constant 0 : index
    %c0_4 = arith.constant 0 : index
    %2 = vector.load %arg1[%c0_2, %c0_3, %c0_4] : memref<1x128x4xf32, #tpu.memory_space<vmem>>, vector<1x128x4xf32>
    %3 = vector.shape_cast %2 : vector<1x128x4xf32> to vector<128x4xf32>
    %cst = arith.constant dense<0.000000e+00> : vector<8x128xf32>
    %4 = tpu.matmul %1, %3, %cst {dimension_numbers = #tpu.dot_dimension_numbers<[1], [1], [0], [0], [0, 0, 1, 0], [], []>} : vector<8x4xf32>, vector<128x4xf32>, vector<8x128xf32> -> vector<8x128xf32>
    %c0_5 = arith.constant 0 : index
    %c0_6 = arith.constant 0 : index
    %c0_7 = arith.constant 0 : index
    %5 = vector.load %arg4[%c0_5, %c0_6, %c0_7] : memref<1x8x128xf32, #tpu.memory_space<vmem>>, vector<1x8x128xf32>
    %6 = vector.shape_cast %5 : vector<1x8x128xf32> to vector<8x128xf32>
    %7 = vector.shape_cast %4 : vector<8x128xf32> to vector<1x8x128xf32>
    tpu.vector_store %arg4[%c0_5, %c0_6, %c0_7], %7 {strides = array<i32>} : memref<1x8x128xf32, #tpu.memory_space<vmem>>, vector<1x8x128xf32>,
    %c0_8 = arith.constant 0 : index
    %c0_9 = arith.constant 0 : index
    %c0_10 = arith.constant 0 : index
    %8 = vector.load %arg2[%c0_8, %c0_9, %c0_10] : memref<1x128x4xf32, #tpu.memory_space<vmem>>, vector<1x128x4xf32>
    %9 = vector.shape_cast %8 : vector<1x128x4xf32> to vector<128x4xf32>
    %cst_11 = arith.constant dense<0.000000e+00> : vector<8x128xf32>
    %10 = tpu.matmul %1, %9, %cst_11 {dimension_numbers = #tpu.dot_dimension_numbers<[1], [1], [0], [0], [0, 0, 1, 0], [], []>} : vector<8x4xf32>, vector<128x4xf32>, vector<8x128xf32> -> vector<8x128xf32>
    %c0_12 = arith.constant 0 : index
    %c0_13 = arith.constant 0 : index
    %c0_14 = arith.constant 0 : index
    %11 = vector.load %arg5[%c0_12, %c0_13, %c0_14] : memref<1x8x128xf32, #tpu.memory_space<vmem>>, vector<1x8x128xf32>
    %12 = vector.shape_cast %11 : vector<1x8x128xf32> to vector<8x128xf32>
    %13 = vector.shape_cast %10 : vector<8x128xf32> to vector<1x8x128xf32>
    tpu.vector_store %arg5[%c0_12, %c0_13, %c0_14], %13 {strides = array<i32>} : memref<1x8x128xf32, #tpu.memory_space<vmem>>, vector<1x8x128xf32>,
    return
  }
  func.func @transform_0(%arg0: i32) -> (i32, i32, i32) {
    %c0_i32 = arith.constant 0 : i32
    %c0_i32_0 = arith.constant 0 : i32
    %c0_i32_1 = arith.constant 0 : i32
    return %arg0, %c0_i32, %c0_i32_0 : i32, i32, i32
  }
  func.func @transform_1(%arg0: i32) -> (i32, i32, i32) {
    %c0_i32 = arith.constant 0 : i32
    %c0_i32_0 = arith.constant 0 : i32
    %c0_i32_1 = arith.constant 0 : i32
    return %arg0, %c0_i32, %c0_i32_0 : i32, i32, i32
  }
  func.func @transform_2(%arg0: i32) -> (i32, i32, i32) {
    %c0_i32 = arith.constant 0 : i32
    %c0_i32_0 = arith.constant 0 : i32
    %c0_i32_1 = arith.constant 0 : i32
    return %arg0, %c0_i32, %c0_i32_0 : i32, i32, i32
  }
  func.func @transform_3(%arg0: i32) -> (i32, i32, i32) {
    %c0_i32 = arith.constant 0 : i32
    %c0_i32_0 = arith.constant 0 : i32
    %c0_i32_1 = arith.constant 0 : i32
    return %arg0, %c0_i32, %c0_i32_0 : i32, i32, i32
  }
  func.func @transform_4(%arg0: i32) -> (i32, i32, i32) {
    %c0_i32 = arith.constant 0 : i32
    %c0_i32_0 = arith.constant 0 : i32
    %c0_i32_1 = arith.constant 0 : i32
    return %arg0, %c0_i32, %c0_i32_0 : i32, i32, i32
  }
}

module attributes {stable_mosaic.version = 11 : i64} {
  func.func @_sqdiff_partial_kernel(%arg0: i32, %arg1: memref<8x128xf32, #tpu.memory_space<vmem>>, %arg2: memref<8x128xf32, #tpu.memory_space<vmem>>, %arg3: memref<1x8x128xf32, #tpu.memory_space<vmem>>) attributes {dimension_semantics = [#tpu.dimension_semantics<parallel>], iteration_bounds = array<i64: 1>, scalar_prefetch = 0 : i64, scratch_operands = 0 : i64, tpu.core_type = #tpu.core_type<tc>, window_params = [{transform_indices = @transform_0, window_bounds = array<i64: 8, 128>}, {transform_indices = @transform_1, window_bounds = array<i64: 8, 128>}, {transform_indices = @transform_2, window_bounds = array<i64: 1, 8, 128>}]} {
    %c0 = arith.constant 0 : index
    %c0_0 = arith.constant 0 : index
    %0 = vector.load %arg1[%c0, %c0_0] : memref<8x128xf32, #tpu.memory_space<vmem>>, vector<8x128xf32>
    %c0_1 = arith.constant 0 : index
    %c0_2 = arith.constant 0 : index
    %1 = vector.load %arg2[%c0_1, %c0_2] : memref<8x128xf32, #tpu.memory_space<vmem>>, vector<8x128xf32>
    %2 = arith.subf %0, %1 : vector<8x128xf32>
    %3 = arith.mulf %2, %2 : vector<8x128xf32>
    %4 = vector.shape_cast %3 : vector<8x128xf32> to vector<1x8x128xf32>
    %cst = arith.constant dense<0.000000e+00> : vector<1xf32>
    %5 = vector.multi_reduction <add>, %4, %cst [1, 2] : vector<1x8x128xf32> to vector<1xf32>
    %6 = vector.shape_cast %5 : vector<1xf32> to vector<1x1x1xf32>
    %7 = vector.extract %6[0, 0, 0] : f32 from vector<1x1x1xf32>
    %8 = vector.broadcast %7 : f32 to vector<1x8x128xf32>
    %c0_3 = arith.constant 0 : index
    %c0_4 = arith.constant 0 : index
    %c0_5 = arith.constant 0 : index
    %9 = vector.load %arg3[%c0_3, %c0_4, %c0_5] : memref<1x8x128xf32, #tpu.memory_space<vmem>>, vector<1x8x128xf32>
    tpu.vector_store %arg3[%c0_3, %c0_4, %c0_5], %8 {strides = array<i32>} : memref<1x8x128xf32, #tpu.memory_space<vmem>>, vector<1x8x128xf32>,
    return
  }
  func.func @transform_0(%arg0: i32) -> (i32, i32) {
    %c0_i32 = arith.constant 0 : i32
    %c0_i32_0 = arith.constant 0 : i32
    return %arg0, %c0_i32 : i32, i32
  }
  func.func @transform_1(%arg0: i32) -> (i32, i32) {
    %c0_i32 = arith.constant 0 : i32
    %c0_i32_0 = arith.constant 0 : i32
    return %arg0, %c0_i32 : i32, i32
  }
  func.func @transform_2(%arg0: i32) -> (i32, i32, i32) {
    %c0_i32 = arith.constant 0 : i32
    %c0_i32_0 = arith.constant 0 : i32
    %c0_i32_1 = arith.constant 0 : i32
    return %arg0, %c0_i32, %c0_i32_0 : i32, i32, i32
  }
}

</mosaic_0001>

<bundles_post_ra>
// kernel: pw_forward.2
= control target key start
LH: loop header
LB: loop body
LE: loop exit
PB: predicated region body
PF: predicated region fallthrough
CT: control target
= control target key end

     0   :  { %s892_s15 = smov 0   ;;  %s1014_s0 = inlined_call_operand.vmem [shape: f32[2,128,4], index: 0, kind: input, shape index: {}]   ;;  %s1015_s1 = inlined_call_operand.vmem [shape: f32[2,128,4], index: 1, kind: input, shape index: {}]   ;;  %s1016_s2 = inlined_call_operand.vmem [shape: f32[2,8,4], index: 2, kind: input, shape index: {}]   ;;  %s1017_s3 = inlined_call_operand.vmem [shape: f32[2,8,128], index: 3, kind: output, shape index: {0}]   ;;  %s1018_s4 = inlined_call_operand.vmem [shape: f32[2,8,128], index: 4, kind: output, shape index: {1}]  }
   0x1 LB: > { %s627_s16 = sadd.s32 4294967295, %s862_s15   ;;  %p631_p0 = scmp.ge.s32.totalorder %s862_s15, 1  ;;  %s862_s15 = sphi %s892_s15, %s15_s15  }
   0x2   : > { %p184_p1 = scmp.lt.s32.totalorder %s862_s15, 3 }
   0x4   : > { %p185_p2 = pnand %p631_p0, %p184_p1 }
   0x5   : > { %p222_p3 = scmp.lt.s32.totalorder (!%p185_p2), %s627_s16, 1  ;;  %v864_v0 = vmov (!%p185_p2), 0.0|0.0   ;;  %vm261_vm0 = vcmask (!%p185_p2), 31744   ;;  %vm865_vm1 = vmmov (!%p185_p2), 0   ;;  %v866_v1 = vmov (!%p185_p2), 0.0  }
   0x6   : > { %188 = sbr.rel (%p185_p2) target bundleno = 296 (0x128), region = 32  ;;  %781 = vmatprep.subr.bf16.mxu0 (!%p185_p2), %v864_v0  ;;  %813 = vmatprep.subr.bf16.mxu1 (!%p185_p2), %v864_v0  ;;  %vm912_vm2 = vmpackc.low (!%p185_p2), %vm261_vm0, %vm261_vm0 }
   0x7   : > { %743 = vmatprep.mubr.msk.f32.mxu0 (!%p185_p2), %vm865_vm1, %v866_v1  ;;  %778 = vmatprep.mubr.msk.f32.mxu1 (!%p185_p2), %vm865_vm1, %v866_v1 }
   0xd   : > { %s1022_s16 = smov (!%p222_p3, %s627_s16), 1 }
   0xe   : > { %s675_s17 = sshll.u32 %s1022_s16, 7  ;;  %s636_s24 = sshll.u32 %s1022_s16, 3 }
   0xf   : > { %s908_s20 = scalar_lea.vmem %s1014_s0, %s675_s17  ;;  %s919_s23 = scalar_lea.vmem %s1015_s1, %s675_s17 }
  0x10   : > { %v245_v3 = vld [vmem:[%s908_s20] sm:$0xff]  ;;  %v246_v4 = vld [vmem:[%s908_s20 + $0x8] sm:$0xff]  ;;  %v247_v9 = vld [vmem:[%s908_s20 + $0x10] sm:$0xff]  ;;  %s235_s27 = scalar_lea.vmem %s1016_s2, %s636_s24  ;;  %s239_s30 = scalar_lea.vmem %s1017_s3, %s636_s24 }
  0x11   : > { %v384_v5 = vld [vmem:[%s919_s23] sm:$0xff]  ;;  %v782_v6 = vpack.c.bf16 %v246_v4, %v245_v3  ;;  %v385_v7 = vld [vmem:[%s919_s23 + $0x8] sm:$0xff]  ;;  %v248_v10 = vld [vmem:[%s908_s20 + $0x18] sm:$0xff]  ;;  %s243_s7 = scalar_lea.vmem %s1018_s4, %s636_s24 }
  0x12   : > { %v814_v8 = vpack.c.bf16 %v385_v7, %v384_v5  ;;  %v386_v11 = vld [vmem:[%s919_s23 + $0x10] sm:$0xff]  ;;  %v387_v12 = vld [vmem:[%s919_s23 + $0x18] sm:$0xff]  ;;  %v786_v13 = vpack.c.bf16 %v248_v10, %v247_v9  ;;  %v249_v15 = vld [vmem:[%s908_s20 + $0x20] sm:$0xff] }
  0x13   : > { %784 = vmatpush3.bf16.xpose.msk.msra.mxu0 %vm912_vm2, %v782_v6  ;;  %v818_v14 = vpack.c.bf16 %v387_v12, %v386_v11  ;;  %v250_v16 = vld [vmem:[%s908_s20 + $0x28] sm:$0xff]  ;;  %v388_v17 = vld [vmem:[%s919_s23 + $0x20] sm:$0xff]  ;;  %v251_v21 = vld [vmem:[%s908_s20 + $0x30] sm:$0xff] }
  0x14   : > { %816 = vmatpush3.bf16.xpose.msk.msra.mxu1 %vm912_vm2, %v814_v8  ;;  %785 = vmatprep.subr.bf16.mxu0 %v864_v0  ;;  %v389_v18 = vld [vmem:[%s919_s23 + $0x28] sm:$0xff]  ;;  %v790_v19 = vpack.c.bf16 %v250_v16, %v249_v15  ;;  %v252_v22 = vld [vmem:[%s908_s20 + $0x38] sm:$0xff]  ;;  %v390_v23 = vld [vmem:[%s919_s23 + $0x30] sm:$0xff] }
  0x15   : > { %817 = vmatprep.subr.bf16.mxu1 %v864_v0  ;;  %v822_v20 = vpack.c.bf16 %v389_v18, %v388_v17  ;;  %v391_v24 = vld [vmem:[%s919_s23 + $0x38] sm:$0xff]  ;;  %v794_v25 = vpack.c.bf16 %v252_v22, %v251_v21  ;;  %v253_v27 = vld [vmem:[%s908_s20 + $0x40] sm:$0xff]  ;;  %v254_v28 = vld [vmem:[%s908_s20 + $0x48] sm:$0xff] }
  0x16   : > { %v826_v26 = vpack.c.bf16 %v391_v24, %v390_v23  ;;  %v392_v29 = vld [vmem:[%s919_s23 + $0x40] sm:$0xff]  ;;  %v393_v30 = vld [vmem:[%s919_s23 + $0x48] sm:$0xff]  ;;  %v798_v31 = vpack.c.bf16 %v254_v28, %v253_v27  ;;  %v255_v33 = vld [vmem:[%s908_s20 + $0x50] sm:$0xff] }
  0x17   : > { %v830_v32 = vpack.c.bf16 %v393_v30, %v392_v29  ;;  %v256_v34 = vld [vmem:[%s908_s20 + $0x58] sm:$0xff]  ;;  %v394_v35 = vld [vmem:[%s919_s23 + $0x50] sm:$0xff]  ;;  %v257_v39 = vld [vmem:[%s908_s20 + $0x60] sm:$0xff] }
  0x18   : > { %v395_v36 = vld [vmem:[%s919_s23 + $0x58] sm:$0xff]  ;;  %v802_v37 = vpack.c.bf16 %v256_v34, %v255_v33  ;;  %v258_v40 = vld [vmem:[%s908_s20 + $0x68] sm:$0xff]  ;;  %v396_v41 = vld [vmem:[%s919_s23 + $0x60] sm:$0xff] }
  0x19   : > { %v834_v38 = vpack.c.bf16 %v395_v36, %v394_v35  ;;  %v397_v42 = vld [vmem:[%s919_s23 + $0x68] sm:$0xff]  ;;  %v806_v43 = vpack.c.bf16 %v258_v40, %v257_v39  ;;  %v259_v45 = vld [vmem:[%s908_s20 + $0x70] sm:$0xff]  ;;  %v260_v46 = vld [vmem:[%s908_s20 + $0x78] sm:$0xff] }
  0x1a   : > { %v838_v44 = vpack.c.bf16 %v397_v42, %v396_v41  ;;  %v398_v47 = vld [vmem:[%s919_s23 + $0x70] sm:$0xff]  ;;  %v399_v48 = vld [vmem:[%s919_s23 + $0x78] sm:$0xff]  ;;  %v810_v49 = vpack.c.bf16 %v260_v46, %v259_v45  ;;  %v244_v51 = vld [vmem:[%s235_s27] sm:$0xff] }
  0x1b   : > { %788 = vmatpush3.bf16.xpose.msk.msra.mxu0 %vm912_vm2, %v786_v13  ;;  %v842_v50 = vpack.c.bf16 %v399_v48, %v398_v47 }
  0x1c   : > { %820 = vmatpush3.bf16.xpose.msk.msra.mxu1 %vm912_vm2, %v818_v14  ;;  %789 = vmatprep.subr.bf16.mxu0 %v864_v0 }
  0x1d   : > { %821 = vmatprep.subr.bf16.mxu1 %v864_v0 }
  0x23   : > { %792 = vmatpush3.bf16.xpose.msk.msra.mxu0 %vm912_vm2, %v790_v19 }
  0x24   : > { %824 = vmatpush3.bf16.xpose.msk.msra.mxu1 %vm912_vm2, %v822_v20  ;;  %793 = vmatprep.subr.bf16.mxu0 %v864_v0 }
  0x25   : > { %825 = vmatprep.subr.bf16.mxu1 %v864_v0 }
  0x2b   : > { %796 = vmatpush3.bf16.xpose.msk.msra.mxu0 %vm912_vm2, %v794_v25 }
  0x2c   : > { %828 = vmatpush3.bf16.xpose.msk.msra.mxu1 %vm912_vm2, %v826_v26  ;;  %797 = vmatprep.subr.bf16.mxu0 %v864_v0 }
  0x2d   : > { %829 = vmatprep.subr.bf16.mxu1 %v864_v0 }
  0x33   : > { %800 = vmatpush3.bf16.xpose.msk.msra.mxu0 %vm912_vm2, %v798_v31 }
  0x34   : > { %832 = vmatpush3.bf16.xpose.msk.msra.mxu1 %vm912_vm2, %v830_v32  ;;  %801 = vmatprep.subr.bf16.mxu0 %v864_v0 }
  0x35   : > { %833 = vmatprep.subr.bf16.mxu1 %v864_v0 }
  0x3b   : > { %804 = vmatpush3.bf16.xpose.msk.msra.mxu0 %vm912_vm2, %v802_v37 }
  0x3c   : > { %836 = vmatpush3.bf16.xpose.msk.msra.mxu1 %vm912_vm2, %v834_v38  ;;  %805 = vmatprep.subr.bf16.mxu0 %v864_v0 }
  0x3d   : > { %837 = vmatprep.subr.bf16.mxu1 %v864_v0 }
  0x43   : > { %808 = vmatpush3.bf16.xpose.msk.msra.mxu0 %vm912_vm2, %v806_v43 }
  0x44   : > { %840 = vmatpush3.bf16.xpose.msk.msra.mxu1 %vm912_vm2, %v838_v44  ;;  %809 = vmatprep.subr.bf16.mxu0 %v864_v0 }
  0x45   : > { %841 = vmatprep.subr.bf16.mxu1 %v864_v0 }
  0x4b   : > { %812 = vmatpush3.bf16.xpose.msk.msra.mxu0 %vm912_vm2, %v810_v49 }
  0x4c   : > { %844 = vmatpush3.bf16.xpose.msk.msra.mxu1 %vm912_vm2, %v842_v50 }
  0x52   : > { %744 = vmatmul.mubr.msk.f32.vlgmr.msra.gmra.mrb[0].mxu0 %vm261_vm0, %v244_v51 }
  0x53   : > { %779 = vmatmul.mubr.msk.f32.vlgmr.msra.gmra.mrb[0].mxu1 %vm261_vm0, %v244_v51 }
 0x125   : > { %v379_v52 = vpop.f32.mrb[0].mxu0 }
 0x126   : > { %383 = vst [vmem:[%s239_s30] sm:$0xff] %v379_v52  ;;  %v514_v53 = vpop.f32.mrb[0].mxu1  ;;  %v745_v54 = vpop.f32.mrb[1].mxu0 }
 0x127   : > { %518 = vst [vmem:[%s243_s7] sm:$0xff] %v514_v53  ;;  %v780_v55 = vpop.f32.mrb[1].mxu1 }
 0x128 PF: > { %s15_s15 = sadd.s32 1, %s862_s15  }
 0x129   : > { %p12_p4 = scmp.ge.s32.totalorder %s15_s15, 4  }
 0x12b   :  { %14 = sbr.rel (!%p12_p4) target bundleno = 1 (0x1), region = 80 }

// kernel: pw_forward.3
= control target key start
LH: loop header
LB: loop body
LE: loop exit
PB: predicated region body
PF: predicated region fallthrough
CT: control target
= control target key end

     0   :  { %s56_s0 = inlined_call_operand.vmem [shape: f32[8,128], index: 0, kind: input, shape index: {}]   ;;  %s57_s1 = inlined_call_operand.vmem [shape: f32[8,128], index: 1, kind: input, shape index: {}]   ;;  %s58_s2 = inlined_call_operand.vmem [shape: f32[1,8,128], index: 2, kind: output, shape index: {}]  }
   0x1   :  { %v11_v0 = vld [vmem:[%s56_s0] sm:$0xff] }
   0x2   :  { %v12_v1 = vld [vmem:[%s57_s1] sm:$0xff] }
   0x3   :  { %v13_v2 = vsub.f32 %v11_v0, %v12_v1 }
   0x5   :  { %v14_v3 = vmul.f32 %v13_v2, %v13_v2 }
   0x7   :  { %15 = vadd.xlane.f32.xlu0 %v14_v3 }
  0x94   :  { %v16_v4 = vpop.xlane.xlu0 %15 }
  0x95   :  { %v17_v5 = vrot.slane %v16_v4, 4 }
  0x97   :  { %v18_v6 = vadd.f32 %v17_v5, %v16_v4 }
  0x99   :  { %v19_v7 = vrot.slane %v18_v6, 2 }
  0x9b   :  { %v20_v8 = vadd.f32 %v19_v7, %v18_v6 }
  0x9d   :  { %v21_v9 = vrot.slane %v20_v8, 1 }
  0x9f   :  { %v22_v10 = vadd.f32 %v21_v9, %v20_v8 }
  0xa1   :  { %30 = vpush %v22_v10 }
  0xd2   :  { %s31_s13 = spop %30 }
  0xd3   :  { %v24_v11 = vstv %s31_s13 }
  0xd4   :  { %25 = vst [vmem:[%s58_s2] sm:$0xff] %v24_v11 }

</bundles_post_ra>
